<compile_context>
chip_gen: v7x
topology: tpu7x:2x2x1
jax: 0.10.0
libtpu: 0.0.40
codegen_flags: <defaults>
</compile_context>

<pallas_src>
import math

import numpy as np
import jax
import jax.numpy as jnp
from jax.experimental import pallas as pl
from jax.experimental.pallas import tpu as pltpu

KERNEL_SET = (2, 3, 6, 7)


def _round_up(v, m):
    return (v + m - 1) // m * m


# ----------------------------------------------------------------------------
# One-time parameter prep (hoisted out of the per-call path).
# ----------------------------------------------------------------------------
def pack_params(weights, biases=None, kernel_set=KERNEL_SET,
                compute_dtype=jnp.float32):
    """Pack the 4 branch kernels into one zero-padded weight (Cout, taps*Cin).

    Branch with kernel size k is right-aligned onto taps s = kmax-k .. kmax-1,
    which reproduces PyTorch's right-crop to the smallest branch length.
    Returns (wt, bias2d) ready for dilated_inception.
    """
    kmax = max(kernel_set)
    cout_b, cin = weights[0].shape[0], weights[0].shape[1]
    cout = cout_b * len(kernel_set)
    wt = np.zeros((cout, kmax * cin), dtype=np.float32)
    for bi, k in enumerate(kernel_set):
        w = np.asarray(weights[bi], dtype=np.float32)          # (cout_b, cin, 1, k)
        for j in range(k):
            s = (kmax - k) + j
            wt[bi * cout_b:(bi + 1) * cout_b, s * cin:(s + 1) * cin] = w[:, :, 0, j]
    wt = jnp.asarray(wt, dtype=compute_dtype)
    bias2d = None
    if biases is not None:
        bias2d = jnp.asarray(
            np.concatenate([np.asarray(b, np.float32) for b in biases]
                           ).reshape(cout, 1), dtype=jnp.float32)
    return wt, bias2d


# ----------------------------------------------------------------------------
# Kernel body.
# ----------------------------------------------------------------------------
def _make_kernel(taps, cin, t_out, dilation, use_bias):
    """Per column-block grid step: for each output time step t, fill a
    (taps*cin, BC) im2col scratch with `taps` contiguous (cin, BC) slab
    copies, run one MXU dot, add bias, lane-dense store."""

    def body(x_ref, wt_ref, b_ref, o_ref, x_unf):
        # x_ref : (T, cin, BC)       input block (lanes = merged batch*node cols)
        # wt_ref: (cout, taps*cin)   packed weights (resident)
        # b_ref : (cout, 1) f32      packed bias   (resident)   [bias path only]
        # o_ref : (t_out, cout, BC)  output block
        # x_unf : (2, taps*cin, BC)  im2col scratch, double-buffered over t
        w = wt_ref[...]
        bias = b_ref[...] if use_bias else None
        for t in range(t_out):                      # static unroll (t_out small)
            slot = t % 2
            for s in range(taps):                   # contiguous slab copies only
                x_unf[slot, s * cin:(s + 1) * cin, :] = x_ref[t + s * dilation]
            acc = jnp.dot(w, x_unf[slot], preferred_element_type=jnp.float32)
            if use_bias:
                acc = acc + bias
            o_ref[t] = acc.astype(o_ref.dtype)      # lane-dense (cout, BC) store

    if use_bias:
        return body

    def body_no_bias(x_ref, wt_ref, o_ref, x_unf):
        body(x_ref, wt_ref, None, o_ref, x_unf)

    return body_no_bias


# ----------------------------------------------------------------------------
# VMEM budgeting / block-width selection.
# ----------------------------------------------------------------------------
def _vmem_capacity_bytes():
    try:
        return int(pltpu.get_tpu_info().vmem_capacity_bytes)
    except Exception:
        return 64 * 1024 * 1024                     # v7x-safe default


def _choose_block_cols(cols, budget_bytes, usage_fn):
    """Column-block width: multiple of 128, ~512 target, minimal padding,
    inside the VMEM budget; small problems use one unpadded block."""
    if cols <= 512:
        bc = cols
    else:
        nblk = max(2, pl.cdiv(cols, 512))
        bc = min(1024, max(128, _round_up(pl.cdiv(cols, nblk), 128)))
        while bc > 128 and usage_fn(bc) > budget_bytes:
            bc -= 128
    cols_p = _round_up(cols, bc)
    return bc, cols_p, cols_p // bc


# ----------------------------------------------------------------------------
# Wrapper.
# ----------------------------------------------------------------------------
def dilated_inception(x, wt, bias2d=None, *, dilation_factor=2,
                      kernel_set=KERNEL_SET, block_cols=None):
    """Pallas implementation of dilated_inception.forward.

    x:      (N, Cin, H, T)
    wt:     (Cout, taps*Cin) packed weight from pack_params (its dtype sets
            the compute dtype; f32 default, bf16 supported, f32 accumulation)
    bias2d: (Cout, 1) f32 packed bias from pack_params, or None
    returns (N, Cout, H, T - d*(max(kernel_set)-1)), dtype of x
    """
    n, cin, h, t_in = x.shape
    kmax = max(kernel_set)
    taps = kmax
    d = dilation_factor
    t_out = t_in - d * (kmax - 1)
    assert t_out > 0, "sequence too short for the largest dilated kernel"
    cout = wt.shape[0]
    assert wt.shape[1] == taps * cin, (wt.shape, taps, cin)
    use_bias = bias2d is not None

    cdt = wt.dtype                                  # compute dtype
    out_dtype = x.dtype
    in_b = jnp.dtype(cdt).itemsize
    out_b = jnp.dtype(out_dtype).itemsize

    # Re-lay input: (N, Cin, H, T) -> (T, Cin, N*H) so the merged (batch, node)
    # axis is on lanes and the tap crop is an outer-dim index.
    cols = n * h
    x_t = jnp.transpose(x.astype(cdt), (3, 1, 0, 2)).reshape(t_in, cin, cols)

    def usage(bc):
        return (2 * t_in * cin * bc * in_b           # input block, double-buffered
                + 2 * t_out * cout * bc * out_b      # output block, double-buffered
                + 2 * taps * cin * bc * in_b         # im2col scratch (2 slots)
                + cout * bc * 4                      # matmul result temp
                + 2 * cout * (taps * cin * in_b + 4))  # resident weight + bias

    capacity = _vmem_capacity_bytes()
    budget = capacity // 4
    if block_cols is None:
        bc, cols_p, ncb = _choose_block_cols(cols, budget, usage)
    else:
        bc = block_cols
        cols_p = _round_up(cols, bc)
        ncb = cols_p // bc
    if cols_p != cols:                               # zero-pad lane dim to a
        x_t = jnp.pad(x_t, ((0, 0), (0, 0), (0, cols_p - cols)))  # bc multiple

    vmem_limit = int(min(capacity // 2, max(usage(bc) + (4 << 20), 16 << 20)))

    in_specs = [
        pl.BlockSpec((t_in, cin, bc), lambda j: (0, 0, j)),       # input col block
        pl.BlockSpec((cout, taps * cin), lambda j: (0, 0)),       # resident weight
    ]
    args = [x_t, wt]
    if use_bias:
        in_specs.append(pl.BlockSpec((cout, 1), lambda j: (0, 0)))  # resident bias
        args.append(bias2d)

    kern = _make_kernel(taps, cin, t_out, d, use_bias)

    out_k = pl.pallas_call(
        kern,
        out_shape=jax.ShapeDtypeStruct((t_out, cout, cols_p), out_dtype),
        grid_spec=pltpu.PrefetchScalarGridSpec(
            num_scalar_prefetch=0,
            grid=(ncb,),
            in_specs=in_specs,
            out_specs=pl.BlockSpec((t_out, cout, bc), lambda j: (0, 0, j)),
            scratch_shapes=[pltpu.VMEM((2, taps * cin, bc), cdt)],
        ),
        compiler_params=pltpu.CompilerParams(
            dimension_semantics=("parallel",),
            vmem_limit_bytes=vmem_limit),
    )(*args)

    # Wrapper-side un-permute (cheap, outside the kernel):
    # (t_out, cout, N*H) -> (N, cout, H, t_out).
    out_k = out_k[:, :, :cols].reshape(t_out, cout, n, h)
    return jnp.transpose(out_k, (2, 1, 3, 0)).astype(out_dtype)


# ----------------------------------------------------------------------------
# Init + pure-JAX reference.
# ----------------------------------------------------------------------------
def init_params(key, cin, cout, kernel_set=KERNEL_SET, dtype=jnp.float32):
    """Deterministic stand-in for nn.Conv2d default init per branch."""
    cout_b = cout // len(kernel_set)
    weights, biases = [], []
    for k in kernel_set:
        key, kw, kb = jax.random.split(key, 3)
        fan_in = cin * 1 * k
        bound = 1.0 / math.sqrt(fan_in)
        weights.append(jax.random.uniform(kw, (cout_b, cin, 1, k),
                                          minval=-bound, maxval=bound,
                                          dtype=dtype))
        biases.append(jax.random.uniform(kb, (cout_b,),
                                         minval=-bound, maxval=bound,
                                         dtype=dtype))
    return weights, biases


def _reference(x, weights, biases, kernel_set=KERNEL_SET, dilation_factor=2):
    """Pure-JAX mirror of the PyTorch forward (conv -> crop -> concat)."""
    outs = []
    for i, _k in enumerate(kernel_set):
        y = jax.lax.conv_general_dilated(
            x, weights[i], window_strides=(1, 1), padding="VALID",
            rhs_dilation=(1, dilation_factor),
            dimension_numbers=("NCHW", "OIHW", "NCHW"))
        if biases is not None:
            y = y + biases[i][None, :, None, None]
        outs.append(y)
    t_min = outs[-1].shape[-1]
    outs = [o[..., -t_min:] for o in outs]
    return jnp.concatenate(outs, axis=1)


if __name__ == "__main__":
    key = jax.random.PRNGKey(0)
    k_p, k_x, k_p2, k_x2 = jax.random.split(key, 4)

    COUT, DIL = 32, 2
    T_CROP = DIL * (max(KERNEL_SET) - 1)

    # Case 1: small shapes consistent with the module (single column block).
    N, CIN, H, T = 2, 4, 16, 16
    weights, biases = init_params(k_p, CIN, COUT)
    x = jax.random.normal(k_x, (N, CIN, H, T), dtype=jnp.float32)
    wt, b2 = pack_params(weights, biases)
    out = jax.block_until_ready(dilated_inception(x, wt, b2, dilation_factor=DIL))
    ref = _reference(x, weights, biases, dilation_factor=DIL)
    assert out.shape == (N, COUT, H, T - T_CROP), out.shape
    assert jnp.allclose(out, ref, atol=1e-4, rtol=1e-4), \
        float(jnp.max(jnp.abs(out - ref)))

    # Case 2: exercises the multi-block / padded-lane path (N*H > 512).
    N2, CIN2, H2, T2 = 4, 8, 160, 20
    weights2, biases2 = init_params(k_p2, CIN2, COUT)
    x2 = jax.random.normal(k_x2, (N2, CIN2, H2, T2), dtype=jnp.float32)
    wt2, b22 = pack_params(weights2, biases2)
    out2 = jax.block_until_ready(dilated_inception(x2, wt2, b22, dilation_factor=DIL))
    ref2 = _reference(x2, weights2, biases2, dilation_factor=DIL)
    assert out2.shape == (N2, COUT, H2, T2 - T_CROP), out2.shape
    assert jnp.allclose(out2, ref2, atol=1e-3, rtol=1e-3), \
        float(jnp.max(jnp.abs(out2 - ref2)))

    print("KERNEL_OK")
</pallas_src>

<mosaic_0001>
module attributes {stable_mosaic.version = 11 : i64} {
  func.func @body(%arg0: i32, %arg1: memref<16x4x32xf32, #tpu.memory_space<vmem>>, %arg2: memref<32x28xf32, #tpu.memory_space<vmem>>, %arg3: memref<32x1xf32, #tpu.memory_space<vmem>>, %arg4: memref<4x32x32xf32, #tpu.memory_space<vmem>>, %arg5: memref<2x28x32xf32, #tpu.memory_space<vmem>>) attributes {dimension_semantics = [#tpu.dimension_semantics<parallel>], iteration_bounds = array<i64: 1>, scalar_prefetch = 0 : i64, scratch_operands = 1 : i64, tpu.core_type = #tpu.core_type<tc>, window_params = [{transform_indices = @transform_0, window_bounds = array<i64: 16, 4, 32>}, {pipeline_mode = #tpu.pipeline_mode<synchronous>, transform_indices = @transform_1, window_bounds = array<i64: 32, 28>}, {pipeline_mode = #tpu.pipeline_mode<synchronous>, transform_indices = @transform_2, window_bounds = array<i64: 32, 1>}, {transform_indices = @transform_3, window_bounds = array<i64: 4, 32, 32>}]} {
    %c0 = arith.constant 0 : index
    %c0_0 = arith.constant 0 : index
    %0 = vector.load %arg2[%c0, %c0_0] : memref<32x28xf32, #tpu.memory_space<vmem>>, vector<32x28xf32>
    %c0_1 = arith.constant 0 : index
    %c0_2 = arith.constant 0 : index
    %1 = vector.load %arg3[%c0_1, %c0_2] : memref<32x1xf32, #tpu.memory_space<vmem>>, vector<32x1xf32>
    %c0_3 = arith.constant 0 : index
    %c0_4 = arith.constant 0 : index
    %c0_5 = arith.constant 0 : index
    %2 = vector.load %arg1[%c0_3, %c0_4, %c0_5] : memref<16x4x32xf32, #tpu.memory_space<vmem>>, vector<1x4x32xf32>
    %3 = vector.shape_cast %2 : vector<1x4x32xf32> to vector<4x32xf32>
    %c0_6 = arith.constant 0 : index
    %c0_7 = arith.constant 0 : index
    %c0_8 = arith.constant 0 : index
    %4 = vector.load %arg5[%c0_6, %c0_7, %c0_8] : memref<2x28x32xf32, #tpu.memory_space<vmem>>, vector<1x4x32xf32>
    %5 = vector.shape_cast %4 : vector<1x4x32xf32> to vector<4x32xf32>
    %6 = vector.shape_cast %3 : vector<4x32xf32> to vector<1x4x32xf32>
    tpu.vector_store %arg5[%c0_6, %c0_7, %c0_8], %6 {strides = array<i32>} : memref<2x28x32xf32, #tpu.memory_space<vmem>>, vector<1x4x32xf32>,
    %c2 = arith.constant 2 : index
    %c0_9 = arith.constant 0 : index
    %c0_10 = arith.constant 0 : index
    %7 = vector.load %arg1[%c2, %c0_9, %c0_10] : memref<16x4x32xf32, #tpu.memory_space<vmem>>, vector<1x4x32xf32>
    %8 = vector.shape_cast %7 : vector<1x4x32xf32> to vector<4x32xf32>
    %c0_11 = arith.constant 0 : index
    %c4 = arith.constant 4 : index
    %c0_12 = arith.constant 0 : index
    %9 = vector.load %arg5[%c0_11, %c4, %c0_12] : memref<2x28x32xf32, #tpu.memory_space<vmem>>, vector<1x4x32xf32>
    %10 = vector.shape_cast %9 : vector<1x4x32xf32> to vector<4x32xf32>
    %11 = vector.shape_cast %8 : vector<4x32xf32> to vector<1x4x32xf32>
    tpu.vector_store %arg5[%c0_11, %c4, %c0_12], %11 {strides = array<i32>} : memref<2x28x32xf32, #tpu.memory_space<vmem>>, vector<1x4x32xf32>,
    %c4_13 = arith.constant 4 : index
    %c0_14 = arith.constant 0 : index
    %c0_15 = arith.constant 0 : index
    %12 = vector.load %arg1[%c4_13, %c0_14, %c0_15] : memref<16x4x32xf32, #tpu.memory_space<vmem>>, vector<1x4x32xf32>
    %13 = vector.shape_cast %12 : vector<1x4x32xf32> to vector<4x32xf32>
    %c0_16 = arith.constant 0 : index
    %c8 = arith.constant 8 : index
    %c0_17 = arith.constant 0 : index
    %14 = vector.load %arg5[%c0_16, %c8, %c0_17] : memref<2x28x32xf32, #tpu.memory_space<vmem>>, vector<1x4x32xf32>
    %15 = vector.shape_cast %14 : vector<1x4x32xf32> to vector<4x32xf32>
    %16 = vector.shape_cast %13 : vector<4x32xf32> to vector<1x4x32xf32>
    tpu.vector_store %arg5[%c0_16, %c8, %c0_17], %16 {strides = array<i32>} : memref<2x28x32xf32, #tpu.memory_space<vmem>>, vector<1x4x32xf32>,
    %c6 = arith.constant 6 : index
    %c0_18 = arith.constant 0 : index
    %c0_19 = arith.constant 0 : index
    %17 = vector.load %arg1[%c6, %c0_18, %c0_19] : memref<16x4x32xf32, #tpu.memory_space<vmem>>, vector<1x4x32xf32>
    %18 = vector.shape_cast %17 : vector<1x4x32xf32> to vector<4x32xf32>
    %c0_20 = arith.constant 0 : index
    %c12 = arith.constant 12 : index
    %c0_21 = arith.constant 0 : index
    %19 = vector.load %arg5[%c0_20, %c12, %c0_21] : memref<2x28x32xf32, #tpu.memory_space<vmem>>, vector<1x4x32xf32>
    %20 = vector.shape_cast %19 : vector<1x4x32xf32> to vector<4x32xf32>
    %21 = vector.shape_cast %18 : vector<4x32xf32> to vector<1x4x32xf32>
    tpu.vector_store %arg5[%c0_20, %c12, %c0_21], %21 {strides = array<i32>} : memref<2x28x32xf32, #tpu.memory_space<vmem>>, vector<1x4x32xf32>,
    %c8_22 = arith.constant 8 : index
    %c0_23 = arith.constant 0 : index
    %c0_24 = arith.constant 0 : index
    %22 = vector.load %arg1[%c8_22, %c0_23, %c0_24] : memref<16x4x32xf32, #tpu.memory_space<vmem>>, vector<1x4x32xf32>
    %23 = vector.shape_cast %22 : vector<1x4x32xf32> to vector<4x32xf32>
    %c0_25 = arith.constant 0 : index
    %c16 = arith.constant 16 : index
    %c0_26 = arith.constant 0 : index
    %24 = vector.load %arg5[%c0_25, %c16, %c0_26] : memref<2x28x32xf32, #tpu.memory_space<vmem>>, vector<1x4x32xf32>
    %25 = vector.shape_cast %24 : vector<1x4x32xf32> to vector<4x32xf32>
    %26 = vector.shape_cast %23 : vector<4x32xf32> to vector<1x4x32xf32>
    tpu.vector_store %arg5[%c0_25, %c16, %c0_26], %26 {strides = array<i32>} : memref<2x28x32xf32, #tpu.memory_space<vmem>>, vector<1x4x32xf32>,
    %c10 = arith.constant 10 : index
    %c0_27 = arith.constant 0 : index
    %c0_28 = arith.constant 0 : index
    %27 = vector.load %arg1[%c10, %c0_27, %c0_28] : memref<16x4x32xf32, #tpu.memory_space<vmem>>, vector<1x4x32xf32>
    %28 = vector.shape_cast %27 : vector<1x4x32xf32> to vector<4x32xf32>
    %c0_29 = arith.constant 0 : index
    %c20 = arith.constant 20 : index
    %c0_30 = arith.constant 0 : index
    %29 = vector.load %arg5[%c0_29, %c20, %c0_30] : memref<2x28x32xf32, #tpu.memory_space<vmem>>, vector<1x4x32xf32>
    %30 = vector.shape_cast %29 : vector<1x4x32xf32> to vector<4x32xf32>
    %31 = vector.shape_cast %28 : vector<4x32xf32> to vector<1x4x32xf32>
    tpu.vector_store %arg5[%c0_29, %c20, %c0_30], %31 {strides = array<i32>} : memref<2x28x32xf32, #tpu.memory_space<vmem>>, vector<1x4x32xf32>,
    %c12_31 = arith.constant 12 : index
    %c0_32 = arith.constant 0 : index
    %c0_33 = arith.constant 0 : index
    %32 = vector.load %arg1[%c12_31, %c0_32, %c0_33] : memref<16x4x32xf32, #tpu.memory_space<vmem>>, vector<1x4x32xf32>
    %33 = vector.shape_cast %32 : vector<1x4x32xf32> to vector<4x32xf32>
    %c0_34 = arith.constant 0 : index
    %c24 = arith.constant 24 : index
    %c0_35 = arith.constant 0 : index
    %34 = vector.load %arg5[%c0_34, %c24, %c0_35] : memref<2x28x32xf32, #tpu.memory_space<vmem>>, vector<1x4x32xf32>
    %35 = vector.shape_cast %34 : vector<1x4x32xf32> to vector<4x32xf32>
    %36 = vector.shape_cast %33 : vector<4x32xf32> to vector<1x4x32xf32>
    tpu.vector_store %arg5[%c0_34, %c24, %c0_35], %36 {strides = array<i32>} : memref<2x28x32xf32, #tpu.memory_space<vmem>>, vector<1x4x32xf32>,
    %c0_36 = arith.constant 0 : index
    %c0_37 = arith.constant 0 : index
    %c0_38 = arith.constant 0 : index
    %37 = vector.load %arg5[%c0_36, %c0_37, %c0_38] : memref<2x28x32xf32, #tpu.memory_space<vmem>>, vector<1x28x32xf32>
    %38 = vector.shape_cast %37 : vector<1x28x32xf32> to vector<28x32xf32>
    %cst = arith.constant dense<0.000000e+00> : vector<32x32xf32>
    %39 = tpu.matmul %0, %38, %cst {dimension_numbers = #tpu.dot_dimension_numbers<[1], [0], [0], [1], [0, 0, 1, 1], [], []>} : vector<32x28xf32>, vector<28x32xf32>, vector<32x32xf32> -> vector<32x32xf32>
    %40 = vector.broadcast %1 : vector<32x1xf32> to vector<32x32xf32>
    %41 = arith.addf %39, %40 : vector<32x32xf32>
    %c0_39 = arith.constant 0 : index
    %c0_40 = arith.constant 0 : index
    %c0_41 = arith.constant 0 : index
    %42 = vector.load %arg4[%c0_39, %c0_40, %c0_41] : memref<4x32x32xf32, #tpu.memory_space<vmem>>, vector<1x32x32xf32>
    %43 = vector.shape_cast %42 : vector<1x32x32xf32> to vector<32x32xf32>
    %44 = vector.shape_cast %41 : vector<32x32xf32> to vector<1x32x32xf32>
    tpu.vector_store %arg4[%c0_39, %c0_40, %c0_41], %44 {strides = array<i32>} : memref<4x32x32xf32, #tpu.memory_space<vmem>>, vector<1x32x32xf32>,
    %c1 = arith.constant 1 : index
    %c0_42 = arith.constant 0 : index
    %c0_43 = arith.constant 0 : index
    %45 = vector.load %arg1[%c1, %c0_42, %c0_43] : memref<16x4x32xf32, #tpu.memory_space<vmem>>, vector<1x4x32xf32>
    %46 = vector.shape_cast %45 : vector<1x4x32xf32> to vector<4x32xf32>
    %c1_44 = arith.constant 1 : index
    %c0_45 = arith.constant 0 : index
    %c0_46 = arith.constant 0 : index
    %47 = vector.load %arg5[%c1_44, %c0_45, %c0_46] : memref<2x28x32xf32, #tpu.memory_space<vmem>>, vector<1x4x32xf32>
    %48 = vector.shape_cast %47 : vector<1x4x32xf32> to vector<4x32xf32>
    %49 = vector.shape_cast %46 : vector<4x32xf32> to vector<1x4x32xf32>
    tpu.vector_store %arg5[%c1_44, %c0_45, %c0_46], %49 {strides = array<i32>} : memref<2x28x32xf32, #tpu.memory_space<vmem>>, vector<1x4x32xf32>,
    %c3 = arith.constant 3 : index
    %c0_47 = arith.constant 0 : index
    %c0_48 = arith.constant 0 : index
    %50 = vector.load %arg1[%c3, %c0_47, %c0_48] : memref<16x4x32xf32, #tpu.memory_space<vmem>>, vector<1x4x32xf32>
    %51 = vector.shape_cast %50 : vector<1x4x32xf32> to vector<4x32xf32>
    %c1_49 = arith.constant 1 : index
    %c4_50 = arith.constant 4 : index
    %c0_51 = arith.constant 0 : index
    %52 = vector.load %arg5[%c1_49, %c4_50, %c0_51] : memref<2x28x32xf32, #tpu.memory_space<vmem>>, vector<1x4x32xf32>
    %53 = vector.shape_cast %52 : vector<1x4x32xf32> to vector<4x32xf32>
    %54 = vector.shape_cast %51 : vector<4x32xf32> to vector<1x4x32xf32>
    tpu.vector_store %arg5[%c1_49, %c4_50, %c0_51], %54 {strides = array<i32>} : memref<2x28x32xf32, #tpu.memory_space<vmem>>, vector<1x4x32xf32>,
    %c5 = arith.constant 5 : index
    %c0_52 = arith.constant 0 : index
    %c0_53 = arith.constant 0 : index
    %55 = vector.load %arg1[%c5, %c0_52, %c0_53] : memref<16x4x32xf32, #tpu.memory_space<vmem>>, vector<1x4x32xf32>
    %56 = vector.shape_cast %55 : vector<1x4x32xf32> to vector<4x32xf32>
    %c1_54 = arith.constant 1 : index
    %c8_55 = arith.constant 8 : index
    %c0_56 = arith.constant 0 : index
    %57 = vector.load %arg5[%c1_54, %c8_55, %c0_56] : memref<2x28x32xf32, #tpu.memory_space<vmem>>, vector<1x4x32xf32>
    %58 = vector.shape_cast %57 : vector<1x4x32xf32> to vector<4x32xf32>
    %59 = vector.shape_cast %56 : vector<4x32xf32> to vector<1x4x32xf32>
    tpu.vector_store %arg5[%c1_54, %c8_55, %c0_56], %59 {strides = array<i32>} : memref<2x28x32xf32, #tpu.memory_space<vmem>>, vector<1x4x32xf32>,
    %c7 = arith.constant 7 : index
    %c0_57 = arith.constant 0 : index
    %c0_58 = arith.constant 0 : index
    %60 = vector.load %arg1[%c7, %c0_57, %c0_58] : memref<16x4x32xf32, #tpu.memory_space<vmem>>, vector<1x4x32xf32>
    %61 = vector.shape_cast %60 : vector<1x4x32xf32> to vector<4x32xf32>
    %c1_59 = arith.constant 1 : index
    %c12_60 = arith.constant 12 : index
    %c0_61 = arith.constant 0 : index
    %62 = vector.load %arg5[%c1_59, %c12_60, %c0_61] : memref<2x28x32xf32, #tpu.memory_space<vmem>>, vector<1x4x32xf32>
    %63 = vector.shape_cast %62 : vector<1x4x32xf32> to vector<4x32xf32>
    %64 = vector.shape_cast %61 : vector<4x32xf32> to vector<1x4x32xf32>
    tpu.vector_store %arg5[%c1_59, %c12_60, %c0_61], %64 {strides = array<i32>} : memref<2x28x32xf32, #tpu.memory_space<vmem>>, vector<1x4x32xf32>,
    %c9 = arith.constant 9 : index
    %c0_62 = arith.constant 0 : index
    %c0_63 = arith.constant 0 : index
    %65 = vector.load %arg1[%c9, %c0_62, %c0_63] : memref<16x4x32xf32, #tpu.memory_space<vmem>>, vector<1x4x32xf32>
    %66 = vector.shape_cast %65 : vector<1x4x32xf32> to vector<4x32xf32>
    %c1_64 = arith.constant 1 : index
    %c16_65 = arith.constant 16 : index
    %c0_66 = arith.constant 0 : index
    %67 = vector.load %arg5[%c1_64, %c16_65, %c0_66] : memref<2x28x32xf32, #tpu.memory_space<vmem>>, vector<1x4x32xf32>
    %68 = vector.shape_cast %67 : vector<1x4x32xf32> to vector<4x32xf32>
    %69 = vector.shape_cast %66 : vector<4x32xf32> to vector<1x4x32xf32>
    tpu.vector_store %arg5[%c1_64, %c16_65, %c0_66], %69 {strides = array<i32>} : memref<2x28x32xf32, #tpu.memory_space<vmem>>, vector<1x4x32xf32>,
    %c11 = arith.constant 11 : index
    %c0_67 = arith.constant 0 : index
    %c0_68 = arith.constant 0 : index
    %70 = vector.load %arg1[%c11, %c0_67, %c0_68] : memref<16x4x32xf32, #tpu.memory_space<vmem>>, vector<1x4x32xf32>
    %71 = vector.shape_cast %70 : vector<1x4x32xf32> to vector<4x32xf32>
    %c1_69 = arith.constant 1 : index
    %c20_70 = arith.constant 20 : index
    %c0_71 = arith.constant 0 : index
    %72 = vector.load %arg5[%c1_69, %c20_70, %c0_71] : memref<2x28x32xf32, #tpu.memory_space<vmem>>, vector<1x4x32xf32>
    %73 = vector.shape_cast %72 : vector<1x4x32xf32> to vector<4x32xf32>
    %74 = vector.shape_cast %71 : vector<4x32xf32> to vector<1x4x32xf32>
    tpu.vector_store %arg5[%c1_69, %c20_70, %c0_71], %74 {strides = array<i32>} : memref<2x28x32xf32, #tpu.memory_space<vmem>>, vector<1x4x32xf32>,
    %c13 = arith.constant 13 : index
    %c0_72 = arith.constant 0 : index
    %c0_73 = arith.constant 0 : index
    %75 = vector.load %arg1[%c13, %c0_72, %c0_73] : memref<16x4x32xf32, #tpu.memory_space<vmem>>, vector<1x4x32xf32>
    %76 = vector.shape_cast %75 : vector<1x4x32xf32> to vector<4x32xf32>
    %c1_74 = arith.constant 1 : index
    %c24_75 = arith.constant 24 : index
    %c0_76 = arith.constant 0 : index
    %77 = vector.load %arg5[%c1_74, %c24_75, %c0_76] : memref<2x28x32xf32, #tpu.memory_space<vmem>>, vector<1x4x32xf32>
    %78 = vector.shape_cast %77 : vector<1x4x32xf32> to vector<4x32xf32>
    %79 = vector.shape_cast %76 : vector<4x32xf32> to vector<1x4x32xf32>
    tpu.vector_store %arg5[%c1_74, %c24_75, %c0_76], %79 {strides = array<i32>} : memref<2x28x32xf32, #tpu.memory_space<vmem>>, vector<1x4x32xf32>,
    %c1_77 = arith.constant 1 : index
    %c0_78 = arith.constant 0 : index
    %c0_79 = arith.constant 0 : index
    %80 = vector.load %arg5[%c1_77, %c0_78, %c0_79] : memref<2x28x32xf32, #tpu.memory_space<vmem>>, vector<1x28x32xf32>
    %81 = vector.shape_cast %80 : vector<1x28x32xf32> to vector<28x32xf32>
    %cst_80 = arith.constant dense<0.000000e+00> : vector<32x32xf32>
    %82 = tpu.matmul %0, %81, %cst_80 {dimension_numbers = #tpu.dot_dimension_numbers<[1], [0], [0], [1], [0, 0, 1, 1], [], []>} : vector<32x28xf32>, vector<28x32xf32>, vector<32x32xf32> -> vector<32x32xf32>
    %83 = vector.broadcast %1 : vector<32x1xf32> to vector<32x32xf32>
    %84 = arith.addf %82, %83 : vector<32x32xf32>
    %c1_81 = arith.constant 1 : index
    %c0_82 = arith.constant 0 : index
    %c0_83 = arith.constant 0 : index
    %85 = vector.load %arg4[%c1_81, %c0_82, %c0_83] : memref<4x32x32xf32, #tpu.memory_space<vmem>>, vector<1x32x32xf32>
    %86 = vector.shape_cast %85 : vector<1x32x32xf32> to vector<32x32xf32>
    %87 = vector.shape_cast %84 : vector<32x32xf32> to vector<1x32x32xf32>
    tpu.vector_store %arg4[%c1_81, %c0_82, %c0_83], %87 {strides = array<i32>} : memref<4x32x32xf32, #tpu.memory_space<vmem>>, vector<1x32x32xf32>,
    %c2_84 = arith.constant 2 : index
    %c0_85 = arith.constant 0 : index
    %c0_86 = arith.constant 0 : index
    %88 = vector.load %arg1[%c2_84, %c0_85, %c0_86] : memref<16x4x32xf32, #tpu.memory_space<vmem>>, vector<1x4x32xf32>
    %89 = vector.shape_cast %88 : vector<1x4x32xf32> to vector<4x32xf32>
    %c0_87 = arith.constant 0 : index
    %c0_88 = arith.constant 0 : index
    %c0_89 = arith.constant 0 : index
    %90 = vector.load %arg5[%c0_87, %c0_88, %c0_89] : memref<2x28x32xf32, #tpu.memory_space<vmem>>, vector<1x4x32xf32>
    %91 = vector.shape_cast %90 : vector<1x4x32xf32> to vector<4x32xf32>
    %92 = vector.shape_cast %89 : vector<4x32xf32> to vector<1x4x32xf32>
    tpu.vector_store %arg5[%c0_87, %c0_88, %c0_89], %92 {strides = array<i32>} : memref<2x28x32xf32, #tpu.memory_space<vmem>>, vector<1x4x32xf32>,
    %c4_90 = arith.constant 4 : index
    %c0_91 = arith.constant 0 : index
    %c0_92 = arith.constant 0 : index
    %93 = vector.load %arg1[%c4_90, %c0_91, %c0_92] : memref<16x4x32xf32, #tpu.memory_space<vmem>>, vector<1x4x32xf32>
    %94 = vector.shape_cast %93 : vector<1x4x32xf32> to vector<4x32xf32>
    %c0_93 = arith.constant 0 : index
    %c4_94 = arith.constant 4 : index
    %c0_95 = arith.constant 0 : index
    %95 = vector.load %arg5[%c0_93, %c4_94, %c0_95] : memref<2x28x32xf32, #tpu.memory_space<vmem>>, vector<1x4x32xf32>
    %96 = vector.shape_cast %95 : vector<1x4x32xf32> to vector<4x32xf32>
    %97 = vector.shape_cast %94 : vector<4x32xf32> to vector<1x4x32xf32>
    tpu.vector_store %arg5[%c0_93, %c4_94, %c0_95], %97 {strides = array<i32>} : memref<2x28x32xf32, #tpu.memory_space<vmem>>, vector<1x4x32xf32>,
    %c6_96 = arith.constant 6 : index
    %c0_97 = arith.constant 0 : index
    %c0_98 = arith.constant 0 : index
    %98 = vector.load %arg1[%c6_96, %c0_97, %c0_98] : memref<16x4x32xf32, #tpu.memory_space<vmem>>, vector<1x4x32xf32>
    %99 = vector.shape_cast %98 : vector<1x4x32xf32> to vector<4x32xf32>
    %c0_99 = arith.constant 0 : index
    %c8_100 = arith.constant 8 : index
    %c0_101 = arith.constant 0 : index
    %100 = vector.load %arg5[%c0_99, %c8_100, %c0_101] : memref<2x28x32xf32, #tpu.memory_space<vmem>>, vector<1x4x32xf32>
    %101 = vector.shape_cast %100 : vector<1x4x32xf32> to vector<4x32xf32>
    %102 = vector.shape_cast %99 : vector<4x32xf32> to vector<1x4x32xf32>
    tpu.vector_store %arg5[%c0_99, %c8_100, %c0_101], %102 {strides = array<i32>} : memref<2x28x32xf32, #tpu.memory_space<vmem>>, vector<1x4x32xf32>,
    %c8_102 = arith.constant 8 : index
    %c0_103 = arith.constant 0 : index
    %c0_104 = arith.constant 0 : index
    %103 = vector.load %arg1[%c8_102, %c0_103, %c0_104] : memref<16x4x32xf32, #tpu.memory_space<vmem>>, vector<1x4x32xf32>
    %104 = vector.shape_cast %103 : vector<1x4x32xf32> to vector<4x32xf32>
    %c0_105 = arith.constant 0 : index
    %c12_106 = arith.constant 12 : index
    %c0_107 = arith.constant 0 : index
    %105 = vector.load %arg5[%c0_105, %c12_106, %c0_107] : memref<2x28x32xf32, #tpu.memory_space<vmem>>, vector<1x4x32xf32>
    %106 = vector.shape_cast %105 : vector<1x4x32xf32> to vector<4x32xf32>
    %107 = vector.shape_cast %104 : vector<4x32xf32> to vector<1x4x32xf32>
    tpu.vector_store %arg5[%c0_105, %c12_106, %c0_107], %107 {strides = array<i32>} : memref<2x28x32xf32, #tpu.memory_space<vmem>>, vector<1x4x32xf32>,
    %c10_108 = arith.constant 10 : index
    %c0_109 = arith.constant 0 : index
    %c0_110 = arith.constant 0 : index
    %108 = vector.load %arg1[%c10_108, %c0_109, %c0_110] : memref<16x4x32xf32, #tpu.memory_space<vmem>>, vector<1x4x32xf32>
    %109 = vector.shape_cast %108 : vector<1x4x32xf32> to vector<4x32xf32>
    %c0_111 = arith.constant 0 : index
    %c16_112 = arith.constant 16 : index
    %c0_113 = arith.constant 0 : index
    %110 = vector.load %arg5[%c0_111, %c16_112, %c0_113] : memref<2x28x32xf32, #tpu.memory_space<vmem>>, vector<1x4x32xf32>
    %111 = vector.shape_cast %110 : vector<1x4x32xf32> to vector<4x32xf32>
    %112 = vector.shape_cast %109 : vector<4x32xf32> to vector<1x4x32xf32>
    tpu.vector_store %arg5[%c0_111, %c16_112, %c0_113], %112 {strides = array<i32>} : memref<2x28x32xf32, #tpu.memory_space<vmem>>, vector<1x4x32xf32>,
    %c12_114 = arith.constant 12 : index
    %c0_115 = arith.constant 0 : index
    %c0_116 = arith.constant 0 : index
    %113 = vector.load %arg1[%c12_114, %c0_115, %c0_116] : memref<16x4x32xf32, #tpu.memory_space<vmem>>, vector<1x4x32xf32>
    %114 = vector.shape_cast %113 : vector<1x4x32xf32> to vector<4x32xf32>
    %c0_117 = arith.constant 0 : index
    %c20_118 = arith.constant 20 : index
    %c0_119 = arith.constant 0 : index
    %115 = vector.load %arg5[%c0_117, %c20_118, %c0_119] : memref<2x28x32xf32, #tpu.memory_space<vmem>>, vector<1x4x32xf32>
    %116 = vector.shape_cast %115 : vector<1x4x32xf32> to vector<4x32xf32>
    %117 = vector.shape_cast %114 : vector<4x32xf32> to vector<1x4x32xf32>
    tpu.vector_store %arg5[%c0_117, %c20_118, %c0_119], %117 {strides = array<i32>} : memref<2x28x32xf32, #tpu.memory_space<vmem>>, vector<1x4x32xf32>,
    %c14 = arith.constant 14 : index
    %c0_120 = arith.constant 0 : index
    %c0_121 = arith.constant 0 : index
    %118 = vector.load %arg1[%c14, %c0_120, %c0_121] : memref<16x4x32xf32, #tpu.memory_space<vmem>>, vector<1x4x32xf32>
    %119 = vector.shape_cast %118 : vector<1x4x32xf32> to vector<4x32xf32>
    %c0_122 = arith.constant 0 : index
    %c24_123 = arith.constant 24 : index
    %c0_124 = arith.constant 0 : index
    %120 = vector.load %arg5[%c0_122, %c24_123, %c0_124] : memref<2x28x32xf32, #tpu.memory_space<vmem>>, vector<1x4x32xf32>
    %121 = vector.shape_cast %120 : vector<1x4x32xf32> to vector<4x32xf32>
    %122 = vector.shape_cast %119 : vector<4x32xf32> to vector<1x4x32xf32>
    tpu.vector_store %arg5[%c0_122, %c24_123, %c0_124], %122 {strides = array<i32>} : memref<2x28x32xf32, #tpu.memory_space<vmem>>, vector<1x4x32xf32>,
    %c0_125 = arith.constant 0 : index
    %c0_126 = arith.constant 0 : index
    %c0_127 = arith.constant 0 : index
    %123 = vector.load %arg5[%c0_125, %c0_126, %c0_127] : memref<2x28x32xf32, #tpu.memory_space<vmem>>, vector<1x28x32xf32>
    %124 = vector.shape_cast %123 : vector<1x28x32xf32> to vector<28x32xf32>
    %cst_128 = arith.constant dense<0.000000e+00> : vector<32x32xf32>
    %125 = tpu.matmul %0, %124, %cst_128 {dimension_numbers = #tpu.dot_dimension_numbers<[1], [0], [0], [1], [0, 0, 1, 1], [], []>} : vector<32x28xf32>, vector<28x32xf32>, vector<32x32xf32> -> vector<32x32xf32>
    %126 = vector.broadcast %1 : vector<32x1xf32> to vector<32x32xf32>
    %127 = arith.addf %125, %126 : vector<32x32xf32>
    %c2_129 = arith.constant 2 : index
    %c0_130 = arith.constant 0 : index
    %c0_131 = arith.constant 0 : index
    %128 = vector.load %arg4[%c2_129, %c0_130, %c0_131] : memref<4x32x32xf32, #tpu.memory_space<vmem>>, vector<1x32x32xf32>
    %129 = vector.shape_cast %128 : vector<1x32x32xf32> to vector<32x32xf32>
    %130 = vector.shape_cast %127 : vector<32x32xf32> to vector<1x32x32xf32>
    tpu.vector_store %arg4[%c2_129, %c0_130, %c0_131], %130 {strides = array<i32>} : memref<4x32x32xf32, #tpu.memory_space<vmem>>, vector<1x32x32xf32>,
    %c3_132 = arith.constant 3 : index
    %c0_133 = arith.constant 0 : index
    %c0_134 = arith.constant 0 : index
    %131 = vector.load %arg1[%c3_132, %c0_133, %c0_134] : memref<16x4x32xf32, #tpu.memory_space<vmem>>, vector<1x4x32xf32>
    %132 = vector.shape_cast %131 : vector<1x4x32xf32> to vector<4x32xf32>
    %c1_135 = arith.constant 1 : index
    %c0_136 = arith.constant 0 : index
    %c0_137 = arith.constant 0 : index
    %133 = vector.load %arg5[%c1_135, %c0_136, %c0_137] : memref<2x28x32xf32, #tpu.memory_space<vmem>>, vector<1x4x32xf32>
    %134 = vector.shape_cast %133 : vector<1x4x32xf32> to vector<4x32xf32>
    %135 = vector.shape_cast %132 : vector<4x32xf32> to vector<1x4x32xf32>
    tpu.vector_store %arg5[%c1_135, %c0_136, %c0_137], %135 {strides = array<i32>} : memref<2x28x32xf32, #tpu.memory_space<vmem>>, vector<1x4x32xf32>,
    %c5_138 = arith.constant 5 : index
    %c0_139 = arith.constant 0 : index
    %c0_140 = arith.constant 0 : index
    %136 = vector.load %arg1[%c5_138, %c0_139, %c0_140] : memref<16x4x32xf32, #tpu.memory_space<vmem>>, vector<1x4x32xf32>
    %137 = vector.shape_cast %136 : vector<1x4x32xf32> to vector<4x32xf32>
    %c1_141 = arith.constant 1 : index
    %c4_142 = arith.constant 4 : index
    %c0_143 = arith.constant 0 : index
    %138 = vector.load %arg5[%c1_141, %c4_142, %c0_143] : memref<2x28x32xf32, #tpu.memory_space<vmem>>, vector<1x4x32xf32>
    %139 = vector.shape_cast %138 : vector<1x4x32xf32> to vector<4x32xf32>
    %140 = vector.shape_cast %137 : vector<4x32xf32> to vector<1x4x32xf32>
    tpu.vector_store %arg5[%c1_141, %c4_142, %c0_143], %140 {strides = array<i32>} : memref<2x28x32xf32, #tpu.memory_space<vmem>>, vector<1x4x32xf32>,
    %c7_144 = arith.constant 7 : index
    %c0_145 = arith.constant 0 : index
    %c0_146 = arith.constant 0 : index
    %141 = vector.load %arg1[%c7_144, %c0_145, %c0_146] : memref<16x4x32xf32, #tpu.memory_space<vmem>>, vector<1x4x32xf32>
    %142 = vector.shape_cast %141 : vector<1x4x32xf32> to vector<4x32xf32>
    %c1_147 = arith.constant 1 : index
    %c8_148 = arith.constant 8 : index
    %c0_149 = arith.constant 0 : index
    %143 = vector.load %arg5[%c1_147, %c8_148, %c0_149] : memref<2x28x32xf32, #tpu.memory_space<vmem>>, vector<1x4x32xf32>
    %144 = vector.shape_cast %143 : vector<1x4x32xf32> to vector<4x32xf32>
    %145 = vector.shape_cast %142 : vector<4x32xf32> to vector<1x4x32xf32>
    tpu.vector_store %arg5[%c1_147, %c8_148, %c0_149], %145 {strides = array<i32>} : memref<2x28x32xf32, #tpu.memory_space<vmem>>, vector<1x4x32xf32>,
    %c9_150 = arith.constant 9 : index
    %c0_151 = arith.constant 0 : index
    %c0_152 = arith.constant 0 : index
    %146 = vector.load %arg1[%c9_150, %c0_151, %c0_152] : memref<16x4x32xf32, #tpu.memory_space<vmem>>, vector<1x4x32xf32>
    %147 = vector.shape_cast %146 : vector<1x4x32xf32> to vector<4x32xf32>
    %c1_153 = arith.constant 1 : index
    %c12_154 = arith.constant 12 : index
    %c0_155 = arith.constant 0 : index
    %148 = vector.load %arg5[%c1_153, %c12_154, %c0_155] : memref<2x28x32xf32, #tpu.memory_space<vmem>>, vector<1x4x32xf32>
    %149 = vector.shape_cast %148 : vector<1x4x32xf32> to vector<4x32xf32>
    %150 = vector.shape_cast %147 : vector<4x32xf32> to vector<1x4x32xf32>
    tpu.vector_store %arg5[%c1_153, %c12_154, %c0_155], %150 {strides = array<i32>} : memref<2x28x32xf32, #tpu.memory_space<vmem>>, vector<1x4x32xf32>,
    %c11_156 = arith.constant 11 : index
    %c0_157 = arith.constant 0 : index
    %c0_158 = arith.constant 0 : index
    %151 = vector.load %arg1[%c11_156, %c0_157, %c0_158] : memref<16x4x32xf32, #tpu.memory_space<vmem>>, vector<1x4x32xf32>
    %152 = vector.shape_cast %151 : vector<1x4x32xf32> to vector<4x32xf32>
    %c1_159 = arith.constant 1 : index
    %c16_160 = arith.constant 16 : index
    %c0_161 = arith.constant 0 : index
    %153 = vector.load %arg5[%c1_159, %c16_160, %c0_161] : memref<2x28x32xf32, #tpu.memory_space<vmem>>, vector<1x4x32xf32>
    %154 = vector.shape_cast %153 : vector<1x4x32xf32> to vector<4x32xf32>
    %155 = vector.shape_cast %152 : vector<4x32xf32> to vector<1x4x32xf32>
    tpu.vector_store %arg5[%c1_159, %c16_160, %c0_161], %155 {strides = array<i32>} : memref<2x28x32xf32, #tpu.memory_space<vmem>>, vector<1x4x32xf32>,
    %c13_162 = arith.constant 13 : index
    %c0_163 = arith.constant 0 : index
    %c0_164 = arith.constant 0 : index
    %156 = vector.load %arg1[%c13_162, %c0_163, %c0_164] : memref<16x4x32xf32, #tpu.memory_space<vmem>>, vector<1x4x32xf32>
    %157 = vector.shape_cast %156 : vector<1x4x32xf32> to vector<4x32xf32>
    %c1_165 = arith.constant 1 : index
    %c20_166 = arith.constant 20 : index
    %c0_167 = arith.constant 0 : index
    %158 = vector.load %arg5[%c1_165, %c20_166, %c0_167] : memref<2x28x32xf32, #tpu.memory_space<vmem>>, vector<1x4x32xf32>
    %159 = vector.shape_cast %158 : vector<1x4x32xf32> to vector<4x32xf32>
    %160 = vector.shape_cast %157 : vector<4x32xf32> to vector<1x4x32xf32>
    tpu.vector_store %arg5[%c1_165, %c20_166, %c0_167], %160 {strides = array<i32>} : memref<2x28x32xf32, #tpu.memory_space<vmem>>, vector<1x4x32xf32>,
    %c15 = arith.constant 15 : index
    %c0_168 = arith.constant 0 : index
    %c0_169 = arith.constant 0 : index
    %161 = vector.load %arg1[%c15, %c0_168, %c0_169] : memref<16x4x32xf32, #tpu.memory_space<vmem>>, vector<1x4x32xf32>
    %162 = vector.shape_cast %161 : vector<1x4x32xf32> to vector<4x32xf32>
    %c1_170 = arith.constant 1 : index
    %c24_171 = arith.constant 24 : index
    %c0_172 = arith.constant 0 : index
    %163 = vector.load %arg5[%c1_170, %c24_171, %c0_172] : memref<2x28x32xf32, #tpu.memory_space<vmem>>, vector<1x4x32xf32>
    %164 = vector.shape_cast %163 : vector<1x4x32xf32> to vector<4x32xf32>
    %165 = vector.shape_cast %162 : vector<4x32xf32> to vector<1x4x32xf32>
    tpu.vector_store %arg5[%c1_170, %c24_171, %c0_172], %165 {strides = array<i32>} : memref<2x28x32xf32, #tpu.memory_space<vmem>>, vector<1x4x32xf32>,
    %c1_173 = arith.constant 1 : index
    %c0_174 = arith.constant 0 : index
    %c0_175 = arith.constant 0 : index
    %166 = vector.load %arg5[%c1_173, %c0_174, %c0_175] : memref<2x28x32xf32, #tpu.memory_space<vmem>>, vector<1x28x32xf32>
    %167 = vector.shape_cast %166 : vector<1x28x32xf32> to vector<28x32xf32>
    %cst_176 = arith.constant dense<0.000000e+00> : vector<32x32xf32>
    %168 = tpu.matmul %0, %167, %cst_176 {dimension_numbers = #tpu.dot_dimension_numbers<[1], [0], [0], [1], [0, 0, 1, 1], [], []>} : vector<32x28xf32>, vector<28x32xf32>, vector<32x32xf32> -> vector<32x32xf32>
    %169 = vector.broadcast %1 : vector<32x1xf32> to vector<32x32xf32>
    %170 = arith.addf %168, %169 : vector<32x32xf32>
    %c3_177 = arith.constant 3 : index
    %c0_178 = arith.constant 0 : index
    %c0_179 = arith.constant 0 : index
    %171 = vector.load %arg4[%c3_177, %c0_178, %c0_179] : memref<4x32x32xf32, #tpu.memory_space<vmem>>, vector<1x32x32xf32>
    %172 = vector.shape_cast %171 : vector<1x32x32xf32> to vector<32x32xf32>
    %173 = vector.shape_cast %170 : vector<32x32xf32> to vector<1x32x32xf32>
    tpu.vector_store %arg4[%c3_177, %c0_178, %c0_179], %173 {strides = array<i32>} : memref<4x32x32xf32, #tpu.memory_space<vmem>>, vector<1x32x32xf32>,
    return
  }
  func.func @transform_0(%arg0: i32) -> (i32, i32, i32) {
    %c0_i32 = arith.constant 0 : i32
    %c0_i32_0 = arith.constant 0 : i32
    %c0_i32_1 = arith.constant 0 : i32
    return %c0_i32, %c0_i32_0, %arg0 : i32, i32, i32
  }
  func.func @transform_1(%arg0: i32) -> (i32, i32) {
    %c0_i32 = arith.constant 0 : i32
    %c0_i32_0 = arith.constant 0 : i32
    %c0_i32_1 = arith.constant 0 : i32
    return %c0_i32, %c0_i32_0 : i32, i32
  }
  func.func @transform_2(%arg0: i32) -> (i32, i32) {
    %c0_i32 = arith.constant 0 : i32
    %c0_i32_0 = arith.constant 0 : i32
    %c0_i32_1 = arith.constant 0 : i32
    return %c0_i32, %c0_i32_0 : i32, i32
  }
  func.func @transform_3(%arg0: i32) -> (i32, i32, i32) {
    %c0_i32 = arith.constant 0 : i32
    %c0_i32_0 = arith.constant 0 : i32
    %c0_i32_1 = arith.constant 0 : i32
    return %c0_i32, %c0_i32_0, %arg0 : i32, i32, i32
  }
}

</mosaic_0001>

<bundles_post_ra>
// kernel: tpu_custom_call.1
= control target key start
LH: loop header
LB: loop body
LE: loop exit
PB: predicated region body
PF: predicated region fallthrough
CT: control target
= control target key end

     0   :  { %8 = vsyncpa [#allocation4], 0  ;;  %s918_s0 = inlined_call_operand.hbm [shape: f32[16,4,32], index: 0, kind: input, shape index: {}]   ;;  %s919_s1 = inlined_call_operand.vmem [shape: f32[32,28], index: 1, kind: input, shape index: {}]   ;;  %s920_s2 = inlined_call_operand.vmem [shape: f32[32,1], index: 2, kind: input, shape index: {}]   ;;  %s921_s3 = inlined_call_operand.hbm [shape: f32[4,32,32], index: 3, kind: output, shape index: {}]  }
   0x1   :  { %9 = vsyncpa [#allocation5], 0  ;;  %s755_s12 = smov [#allocation3]   ;;  %s707_s16 = scalar_lea.hbm %s918_s0, 1024 }
   0x2   :  { %s15_s13 = sshll.u32 %s755_s12, 4  ;;  %p708_p0 = scmp.ne.s32.totalorder %s918_s0, %s707_s16  ;;  %s16_s13 = int_to_ptr.vmem [resolvable:$true] %s15_s13 }
   0x3   :  { %p711_p1 = scmp.lt.u32.totalorder %s707_s16, %s918_s0 }
   0x5   :  { %p713_p2 = pnand %p711_p1, %p708_p0 }
   0x7   :  { %716 = shalt.err (!%p713_p2)
}
   0x8   :  { %s717_s21 = scalar_lea.vmem %s16_s13, 1024  ;;  %p722_p4 = scmp.lt.s32.totalorder %s16_s13, %s16_s13 }
   0x9   :  { %p718_p3 = scmp.ne.s32.totalorder %s16_s13, %s717_s21  ;;  %p723_p5 = scmp.lt.s32.totalorder %s717_s21, %s717_s21 }
   0xb   :  { %p724_p6 = por %p723_p5, %p722_p4 }
   0xd   :  { %p725_p7 = pnand %p724_p6, %p718_p3 }
   0xf   :  { %728 = shalt.err (!%p725_p7)
}
  0x10   :  { %s756_s22 = smov 64   ;;  %s757_s23 = smov 4  }
  0x11   :  { %21 = dma.hbm_to_vmem [thread:$0]  %s918_s0, 1024, %s16_s13, [#allocation4], %s756_s22, %s756_s22, %s757_s23  }
  0x12   :  { %751 = dma.done.wait [#allocation4], 1024  }
  0x13   :  { %752 = vsyncadd [#allocation4], 4294966272  ;;  %v758_v0 = vmov 0   ;;  %vm38_vm0 = vcmask 257024   ;;  %v37_v1 = vld [vmem:[#allocation3] sm:$0xf] }
  0x14   :  { %705 = vset.pattern.permute.xlu0 %v758_v0  ;;  %706 = vset.pattern.permute.xlu1 %v758_v0  ;;  %v41_v2 = vld [vmem:[#allocation3 + $0x8] sm:$0xf]  ;;  %v44_v3 = vld [vmem:[#allocation3 + $0x10] sm:$0xf]  ;;  %39 = vst.msk [vmem:[#allocation2] sm:$0xf] %vm38_vm0, %v37_v1 }
  0x15   :  { %42 = vst.msk [vmem:[#allocation2 + $0x4] sm:$0xf] %vm38_vm0, %v41_v2  ;;  %45 = vst.msk [vmem:[#allocation2 + $0x8] sm:$0xf] %vm38_vm0, %v44_v3  ;;  %v47_v4 = vld [vmem:[#allocation3 + $0x18] sm:$0xf] }
  0x16   :  { %48 = vst.msk [vmem:[#allocation2 + $0xc] sm:$0xf] %vm38_vm0, %v47_v4  ;;  %v190_v5 = vld [vmem:[#allocation3 + $0x4] sm:$0xf]  ;;  %v194_v6 = vld [vmem:[#allocation3 + $0xc] sm:$0xf] }
  0x17   :  { %192 = vst.msk [vmem:[#allocation2 + $0x20] sm:$0xf] %vm38_vm0, %v190_v5  ;;  %v197_v7 = vld [vmem:[#allocation3 + $0x14] sm:$0xf]  ;;  %v200_v8 = vld [vmem:[#allocation3 + $0x1c] sm:$0xf] }
  0x18   :  { %v308_v9 = vld [vmem:[#allocation3 + $0x8] sm:$0xf]  ;;  %195 = vst.msk [vmem:[#allocation2 + $0x24] sm:$0xf] %vm38_vm0, %v194_v6  ;;  %198 = vst.msk [vmem:[#allocation2 + $0x28] sm:$0xf] %vm38_vm0, %v197_v7 }
  0x19   :  { %201 = vst.msk [vmem:[#allocation2 + $0x2c] sm:$0xf] %vm38_vm0, %v200_v8  ;;  %vm95_vm1 = vcmask 1043456   ;;  %v310_v10 = vld [vmem:[#allocation3 + $0x10] sm:$0xf]  ;;  %vm82_vm2 = vcmask 228352  }
  0x1a   :  { %v50_v11 = vld [vmem:[#allocation3 + $0x20] sm:$0xf]  ;;  %v53_v12 = vld [vmem:[#allocation3 + $0x28] sm:$0xf]  ;;  %v312_v13 = vld [vmem:[#allocation3 + $0x18] sm:$0xf] }
  0x1b   :  { %v314_v14 = vld [vmem:[#allocation3 + $0x20] sm:$0xf]  ;;  %51 = vst.msk [vmem:[#allocation2 + $0x10] sm:$0xf] %vm38_vm0, %v50_v11  ;;  %54 = vst.msk [vmem:[#allocation2 + $0x14] sm:$0xf] %vm38_vm0, %v53_v12 }
  0x1c   :  { %v56_v15 = vld [vmem:[#allocation3 + $0x30] sm:$0xf]  ;;  %v420_v16 = vld [vmem:[#allocation3 + $0xc] sm:$0xf]  ;;  %v203_v17 = vld [vmem:[#allocation3 + $0x24] sm:$0xf] }
  0x1d   :  { %57 = vst.msk [vmem:[#allocation2 + $0x18] sm:$0xf] %vm38_vm0, %v56_v15  ;;  %v206_v18 = vld [vmem:[#allocation3 + $0x2c] sm:$0xf]  ;;  %v58_v19 = vld [vmem:[#allocation2] sm:$0xff]  ;;  %vm759_vm3 = vmmov 1  }
  0x1e   :  { %v422_v20 = vld [vmem:[#allocation3 + $0x14] sm:$0xf]  ;;  %204 = vst.msk [vmem:[#allocation2 + $0x30] sm:$0xf] %vm38_vm0, %v203_v17  ;;  %207 = vst.msk [vmem:[#allocation2 + $0x34] sm:$0xf] %vm38_vm0, %v206_v18 }
  0x1f   :  { %v209_v21 = vld [vmem:[#allocation3 + $0x34] sm:$0xf]  ;;  %v59_v22 = vld [vmem:[#allocation2 + $0x8] sm:$0xff]  ;;  %309 = vst.msk [vmem:[#allocation2] sm:$0xf] %vm38_vm0, %v308_v9  ;;  %vm814_vm4 = vmpackc.low %vm95_vm1, %vm759_vm3  ;;  %vm184_vm5 = vcmask 261120  }
  0x20   :  { %311 = vst.msk [vmem:[#allocation2 + $0x4] sm:$0xf] %vm38_vm0, %v310_v10  ;;  %v424_v23 = vld [vmem:[#allocation3 + $0x1c] sm:$0xf]  ;;  %v426_v24 = vld [vmem:[#allocation3 + $0x24] sm:$0xf]  ;;  %v657_v25 = vpack.c.bf16 %v59_v22, %v58_v19 }
  0x21   :  { %210 = vst.msk [vmem:[#allocation2 + $0x38] sm:$0xf] %vm38_vm0, %v209_v21  ;;  %313 = vst.msk [vmem:[#allocation2 + $0x8] sm:$0xf] %vm38_vm0, %v312_v13  ;;  %v316_v27 = vld [vmem:[#allocation3 + $0x28] sm:$0xf] }
  0x22   :  { %315 = vst.msk [vmem:[#allocation2 + $0xc] sm:$0xf] %vm38_vm0, %v314_v14  ;;  %v821_v28 = vld [vmem:[%s919_s1] sm:$0xff]  ;;  %v212_v30 = vld [vmem:[#allocation2 + $0x28] sm:$0xff]  ;;  %v318_v31 = vld [vmem:[#allocation3 + $0x30] sm:$0xf]  ;;  %658 = vmatprep.subr.bf16.mxu0 %v657_v25 }
  0x23   :  { %v211_v29 = vld [vmem:[#allocation2 + $0x20] sm:$0xff]  ;;  %609 = vmatprep.mubr.msk.f32.mxu0 %vm82_vm2, %v821_v28  ;;  %623 = vmatprep.mubr.msk.f32.mxu1 %vm82_vm2, %v821_v28  ;;  %425 = vst.msk [vmem:[#allocation2 + $0x28] sm:$0xf] %vm38_vm0, %v424_v23  ;;  %427 = vst.msk [vmem:[#allocation2 + $0x2c] sm:$0xf] %vm38_vm0, %v426_v24  ;;  %v35_v35 = vld [vmem:[%s920_s2 + $0x10] sm:$0xff] }
  0x24   :  { %v667_v32 = vpack.c.bf16 %v212_v30, %v211_v29  ;;  %421 = vst.msk [vmem:[#allocation2 + $0x20] sm:$0xf] %vm38_vm0, %v420_v16  ;;  %423 = vst.msk [vmem:[#allocation2 + $0x24] sm:$0xf] %vm38_vm0, %v422_v20  ;;  %v321_v33 = vld [vmem:[#allocation3 + $0x38] sm:$0xf]  ;;  %660 = vmatpush3.bf16.msra.mxu0 %v657_v25  ;;  %74 = vperm.xlu1 %706, %v35_v35  }
  0x25   :  { %v33_v34 = vld [vmem:[%s920_s2] sm:$0xff]  ;;  %v60_v36 = vld [vmem:[#allocation2 + $0x10] sm:$0xff]  ;;  %v428_v37 = vld [vmem:[#allocation3 + $0x2c] sm:$0xf] }
  0x26   :  { %v430_v38 = vld [vmem:[#allocation3 + $0x34] sm:$0xf]  ;;  %64 = vperm.xlu0 %705, %v33_v34   ;;  %668 = vmatprep.subr.bf16.mxu1 %v667_v32  ;;  %v61_v39 = vld [vmem:[#allocation2 + $0x18] sm:$0xf]  ;;  %317 = vst.msk [vmem:[#allocation2 + $0x10] sm:$0xf] %vm38_vm0, %v316_v27 }
  0x27   :  { %319 = vst.msk [vmem:[#allocation2 + $0x14] sm:$0xf] %vm38_vm0, %v318_v31  ;;  %v433_v40 = vld [vmem:[#allocation3 + $0x3c] sm:$0xf]  ;;  %v34_v41 = vld [vmem:[%s920_s2 + $0x8] sm:$0xff]  ;;  %670 = vmatpush3.bf16.msra.mxu1 %v667_v32  ;;  %v661_v42 = vpack.c.bf16 %v61_v39, %v60_v36  ;;  %v213_v43 = vld [vmem:[#allocation2 + $0x30] sm:$0xff] }
  0x28   :  { %322 = vst.msk [vmem:[#allocation2 + $0x18] sm:$0xf] %vm38_vm0, %v321_v33  ;;  %v36_v44 = vld [vmem:[%s920_s2 + $0x18] sm:$0xff]  ;;  %429 = vst.msk [vmem:[#allocation2 + $0x30] sm:$0xf] %vm38_vm0, %v428_v37  ;;  %v323_v46 = vld [vmem:[#allocation2] sm:$0xff] }
  0x29   :  { %v214_v45 = vld [vmem:[#allocation2 + $0x38] sm:$0xf]  ;;  %431 = vst.msk [vmem:[#allocation2 + $0x34] sm:$0xf] %vm38_vm0, %v430_v38  ;;  %663 = vmatprep.subr.msk.bf16.mxu0 %vm814_vm4, %v661_v42  ;;  %v324_v48 = vld [vmem:[#allocation2 + $0x8] sm:$0xff]  ;;  %79 = vperm.xlu1 %706, %v36_v44   ;;  %v31_v54 = vld [vmem:[%s919_s1 + $0x10] sm:$0xff] }
  0x2a   :  { %v671_v47 = vpack.c.bf16 %v214_v45, %v213_v43  ;;  %434 = vst.msk [vmem:[#allocation2 + $0x38] sm:$0xf] %vm38_vm0, %v433_v40  ;;  %69 = vperm.xlu0 %705, %v34_v41   ;;  %666 = vmatpush3.bf16.msk.msra.mxu0 %vm814_vm4, %v661_v42  ;;  %v30_v49 = vld [vmem:[%s919_s1 + $0x8] sm:$0xff]  ;;  %v677_v50 = vpack.c.bf16 %v324_v48, %v323_v46  ;;  %v32_v56 = vld [vmem:[%s919_s1 + $0x18] sm:$0xff]  ;;  %s760_s1 = smov [#allocation6]  }
  0x2b   :  { %v435_v51 = vld [vmem:[#allocation2 + $0x20] sm:$0xff]  ;;  %v436_v52 = vld [vmem:[#allocation2 + $0x28] sm:$0xff]  ;;  %s537_s13 = sshll.u32 %s760_s1, 4  ;;  %s538_s13 = int_to_ptr.vmem [resolvable:$true] %s537_s13 }
  0x2c   :  { %673 = vmatprep.subr.msk.bf16.mxu1 %vm814_vm4, %v671_v47  ;;  %678 = vmatprep.subr.bf16.mxu0 %v677_v50  ;;  %v687_v53 = vpack.c.bf16 %v436_v52, %v435_v51  ;;  %s729_s14 = scalar_lea.vmem %s538_s13, 2048  ;;  %p734_p9 = scmp.lt.s32.totalorder %s538_s13, %s538_s13 }
  0x2d   :  { %676 = vmatpush3.bf16.msk.msra.mxu1 %vm814_vm4, %v671_v47  ;;  %610 = vmatmul.mubr.msk.f32.vlgmr.msra.gmra.mrb[0].mxu0 %vm82_vm2, %v30_v49  ;;  %p730_p8 = scmp.ne.s32.totalorder %s538_s13, %s729_s14  ;;  %p735_p10 = scmp.lt.s32.totalorder %s729_s14, %s729_s14 }
  0x2e   :  { %v325_v55 = vld [vmem:[#allocation2 + $0x10] sm:$0xff]  ;;  %688 = vmatprep.subr.bf16.mxu1 %v687_v53  ;;  %680 = vmatpush3.bf16.msra.mxu0 %v677_v50 }
  0x2f   :  { %v326_v57 = vld [vmem:[#allocation2 + $0x18] sm:$0xf]  ;;  %612 = vmatprep.mubr.msk.f32.mxu0 %vm82_vm2, %v31_v54  ;;  %p736_p11 = por %p735_p10, %p734_p9 }
  0x30   :  { %624 = vmatmul.mubr.msk.f32.vlgmr.msra.gmra.mrb[0].mxu1 %vm82_vm2, %v30_v49  ;;  %v681_v58 = vpack.c.bf16 %v326_v57, %v325_v55  ;;  %v437_v59 = vld [vmem:[#allocation2 + $0x30] sm:$0xff] }
  0x31   :  { %690 = vmatpush3.bf16.msra.mxu1 %v687_v53  ;;  %626 = vmatprep.mubr.msk.f32.mxu1 %vm82_vm2, %v31_v54  ;;  %v438_v60 = vld [vmem:[#allocation2 + $0x38] sm:$0xf]  ;;  %p737_p12 = pnand %p736_p11, %p730_p8 }
  0x32   :  { %613 = vmatmul.mubr.msk.f32.gmra.mrb[2].mxu0 %vm82_vm2, %v32_v56  ;;  %683 = vmatprep.subr.msk.bf16.mxu0 %vm814_vm4, %v681_v58  ;;  %v691_v61 = vpack.c.bf16 %v438_v60, %v437_v59 }
  0x33   :  { %686 = vmatpush3.bf16.msk.msra.mxu0 %vm814_vm4, %v681_v58  ;;  %637 = vmatprep.mubr.msk.f32.mxu0 %vm82_vm2, %v821_v28 }
  0x34   :  { %627 = vmatmul.mubr.msk.f32.gmra.mrb[2].mxu1 %vm82_vm2, %v32_v56  ;;  %693 = vmatprep.subr.msk.bf16.mxu1 %vm814_vm4, %v691_v61 }
  0x35   :  { %696 = vmatpush3.bf16.msk.msra.mxu1 %vm814_vm4, %v691_v61  ;;  %651 = vmatprep.mubr.msk.f32.mxu1 %vm82_vm2, %v821_v28 }
  0x36   :  { %638 = vmatmul.mubr.msk.f32.vlgmr.msra.gmra.mrb[4].mxu0 %vm82_vm2, %v30_v49 }
  0x37   :  { %640 = vmatprep.mubr.msk.f32.mxu0 %vm82_vm2, %v31_v54 }
  0x38   :  { %652 = vmatmul.mubr.msk.f32.vlgmr.msra.gmra.mrb[4].mxu1 %vm82_vm2, %v30_v49 }
  0x39   :  { %654 = vmatprep.mubr.msk.f32.mxu1 %vm82_vm2, %v31_v54 }
  0x3a   :  { %641 = vmatmul.mubr.msk.f32.gmra.mrb[6].mxu0 %vm82_vm2, %v32_v56 }
  0x3c   :  { %655 = vmatmul.mubr.msk.f32.gmra.mrb[6].mxu1 %vm82_vm2, %v32_v56 }
  0xa3   :  { %v75_v63 = vpop.permute.xlu1 %74 }
  0xa5   :  { %v65_v62 = vpop.permute.xlu0 %64 }
  0xa8   :  { %v80_v6 = vpop.permute.xlu1 %79 }
  0xa9   :  { %v70_v0 = vpop.permute.xlu0 %69 }
 0x100   :  { %v611_v1 = vpop.f32.mrb[0].mxu0 }
 0x101   :  { %v171_v2 = vadd.f32 %v611_v1, %v70_v0  ;;  %v165_v3 = vpop.f32.mrb[1].mxu0 }
 0x102   :  { %v166_v5 = vadd.f32 %v165_v3, %v65_v62 }
 0x103   :  { %v625_v4 = vpop.f32.mrb[0].mxu1  ;;  %186 = vst.msk [vmem:[#allocation6 + $0x8] sm:$0xff] %vm184_vm5, %v171_v2 }
 0x104   :  { %v290_v7 = vadd.f32 %v625_v4, %v70_v0  ;;  %v284_v8 = vpop.f32.mrb[1].mxu1  ;;  %185 = vst.msk [vmem:[#allocation6] sm:$0xff] %vm184_vm5, %v166_v5 }
 0x105   :  { %v285_v9 = vadd.f32 %v284_v8, %v65_v62  ;;  %v614_v10 = vpop.f32.mrb[2].mxu0 }
 0x106   :  { %305 = vst.msk [vmem:[#allocation6 + $0x28] sm:$0xff] %vm184_vm5, %v290_v7  ;;  %v181_v11 = vadd.f32 %v614_v10, %v80_v6  ;;  %v175_v12 = vpop.f32.mrb[3].mxu0 }
 0x107   :  { %304 = vst.msk [vmem:[#allocation6 + $0x20] sm:$0xff] %vm184_vm5, %v285_v9  ;;  %v628_v13 = vpop.f32.mrb[2].mxu1  ;;  %v176_v14 = vadd.f32 %v175_v12, %v75_v63 }
 0x108   :  { %188 = vst.msk [vmem:[#allocation6 + $0x18] sm:$0xff] %vm184_vm5, %v181_v11  ;;  %v300_v15 = vadd.f32 %v628_v13, %v80_v6  ;;  %v294_v16 = vpop.f32.mrb[3].mxu1 }
 0x109   :  { %187 = vst.msk [vmem:[#allocation6 + $0x10] sm:$0xff] %vm184_vm5, %v176_v14  ;;  %v295_v17 = vadd.f32 %v294_v16, %v75_v63  ;;  %v639_v18 = vpop.f32.mrb[4].mxu0 }
 0x10a   :  { %307 = vst.msk [vmem:[#allocation6 + $0x38] sm:$0xff] %vm184_vm5, %v300_v15  ;;  %v402_v19 = vadd.f32 %v639_v18, %v70_v0  ;;  %v396_v20 = vpop.f32.mrb[5].mxu0 }
 0x10b   :  { %306 = vst.msk [vmem:[#allocation6 + $0x30] sm:$0xff] %vm184_vm5, %v295_v17  ;;  %v653_v21 = vpop.f32.mrb[4].mxu1  ;;  %v397_v22 = vadd.f32 %v396_v20, %v65_v62 }
 0x10c   :  { %417 = vst.msk [vmem:[#allocation6 + $0x48] sm:$0xff] %vm184_vm5, %v402_v19  ;;  %v514_v23 = vadd.f32 %v653_v21, %v70_v0  ;;  %v508_v24 = vpop.f32.mrb[5].mxu1 }
 0x10d   :  { %416 = vst.msk [vmem:[#allocation6 + $0x40] sm:$0xff] %vm184_vm5, %v397_v22  ;;  %v509_v25 = vadd.f32 %v508_v24, %v65_v62  ;;  %v642_v26 = vpop.f32.mrb[6].mxu0 }
 0x10e   :  { %529 = vst.msk [vmem:[#allocation6 + $0x68] sm:$0xff] %vm184_vm5, %v514_v23  ;;  %v412_v27 = vadd.f32 %v642_v26, %v80_v6  ;;  %v406_v28 = vpop.f32.mrb[7].mxu0 }
 0x10f   :  { %528 = vst.msk [vmem:[#allocation6 + $0x60] sm:$0xff] %vm184_vm5, %v509_v25  ;;  %v656_v29 = vpop.f32.mrb[6].mxu1  ;;  %v407_v30 = vadd.f32 %v406_v28, %v75_v63 }
 0x110   :  { %419 = vst.msk [vmem:[#allocation6 + $0x58] sm:$0xff] %vm184_vm5, %v412_v27  ;;  %v524_v31 = vadd.f32 %v656_v29, %v80_v6  ;;  %v518_v32 = vpop.f32.mrb[7].mxu1 }
 0x111   :  { %418 = vst.msk [vmem:[#allocation6 + $0x50] sm:$0xff] %vm184_vm5, %v407_v30  ;;  %v519_v33 = vadd.f32 %v518_v32, %v75_v63 }
 0x112   :  { %531 = vst.msk [vmem:[#allocation6 + $0x78] sm:$0xff] %vm184_vm5, %v524_v31 }
 0x113   :  { %530 = vst.msk [vmem:[#allocation6 + $0x70] sm:$0xff] %vm184_vm5, %v519_v33 }
 0x114   :  { %740 = shalt.err (!%p737_p12)
}
 0x115   :  { %s741_s17 = scalar_lea.hbm %s921_s3, 2048 }
 0x116   :  { %p742_p13 = scmp.ne.s32.totalorder %s921_s3, %s741_s17  ;;  %p745_p0 = scmp.lt.u32.totalorder %s741_s17, %s921_s3 }
 0x118   :  { %p747_p1 = pnand %p745_p0, %p742_p13 }
 0x11a   :  { %750 = shalt.err (!%p747_p1)
}
 0x11b   :  { %s761_s22 = smov 128   ;;  %s762_s23 = smov 8  }
 0x11c   :  { %543 = dma.vmem_to_hbm [thread:$0]  %s538_s13, 2048, %s921_s3, [#allocation5], %s761_s22, %s761_s22, %s762_s23  }
 0x11d   :  { %753 = dma.done.wait [#allocation5], 2048  }
 0x11e   :  { %754 = vsyncadd [#allocation5], 4294965248 }
 0x11f   :  { %547 = vsyncpa [#allocation4], 1 }
 0x120   :  { %548 = vsyncpa [#allocation5], 1 }

</bundles_post_ra>
